<compile_context>
chip_gen: v7x
topology: tpu7x:2x2x1
jax: 0.10.0
libtpu: 0.0.40
codegen_flags: <defaults>
</compile_context>

<pallas_src>
import math

import jax
import jax.numpy as jnp
from jax.experimental import pallas as pl
from jax.experimental.pallas import tpu as pltpu


# ----------------------------------------------------------------------------
# Buffer setup (plain JAX glue): build `pe` exactly as the PyTorch __init__.
# ----------------------------------------------------------------------------
def make_positional_encoding(d_model: int, max_len: int = 50) -> jnp.ndarray:
    position = jnp.arange(0, max_len, dtype=jnp.float32)[:, None]        # (L, 1)
    div_term = jnp.exp(
        jnp.arange(0, d_model, 2, dtype=jnp.float32)
        * (-math.log(10000.0) / d_model)
    )                                                                     # (D/2,)
    pe = jnp.zeros((max_len, d_model), dtype=jnp.float32)
    pe = pe.at[:, 0::2].set(jnp.sin(position * div_term))
    pe = pe.at[:, 1::2].set(jnp.cos(position * div_term))
    # .unsqueeze(0).transpose(0, 1)  ->  (max_len, 1, d_model)
    return pe[:, None, :]


# ----------------------------------------------------------------------------
# Pallas kernels: pure streaming elementwise work on lane-dense (rows, D) tiles
# ----------------------------------------------------------------------------
def _posenc_eval_kernel(x_ref, pe_ref, o_ref):
    o_ref[...] = x_ref[...] + pe_ref[...]


def _posenc_train_kernel(x_ref, pe_ref, mask_ref, o_ref):
    # mask already carries the 1/(1-p) inverted-dropout scale (0 where dropped),
    # so this is a single fused multiply-add stream (no select / zeros tensor).
    o_ref[...] = (x_ref[...] + pe_ref[...]) * mask_ref[...]


# ----------------------------------------------------------------------------
# Wrapper
# ----------------------------------------------------------------------------
def _row_block(num_rows: int, block_rows: int) -> int:
    """Pick a row-tile size: <= block_rows, multiple of 8 sublanes when tiling."""
    tr = min(block_rows, num_rows)
    if tr < num_rows:
        tr = max(8, (tr // 8) * 8)
    return tr


def positional_encoding_forward(x, pe, *, p: float = 0.1, training: bool = False,
                                rng_key=None, block_rows: int = 512):
    """x: (S, B, D), pe: (max_len, 1, D).  Returns dropout(x + pe[:S])."""
    S, B, D = x.shape
    max_len = pe.shape[0]
    if S > max_len:
        raise ValueError(f"sequence length {S} exceeds max_len {max_len}")

    R = S * B
    x2 = x.reshape(R, D)
    # Lane-dense pe slab: broadcast over batch once in the wrapper (pe is at
    # most max_len x d_model floats, so this stays tiny) and flatten to (R, D).
    pe2 = jnp.broadcast_to(pe[:S], (S, B, D)).reshape(R, D).astype(x.dtype)

    # Row tiling: ~512 rows is a good default across v5e/v6e/v7x (v6e could go
    # 1024 with its 128 MiB VMEM; 512 keeps v7x's 64 MiB comfortable).
    tr = _row_block(R, block_rows)
    grid = (pl.cdiv(R, tr),)
    row_spec = pl.BlockSpec((tr, D), lambda i: (i, 0))

    itemsize = jnp.dtype(x.dtype).itemsize
    compiler_params = pltpu.CompilerParams(
        dimension_semantics=("parallel",),          # megacore split on v7x
        vmem_limit_bytes=32 * 1024 * 1024,          # explicit, safe on all chips
    )
    out_shape = jax.ShapeDtypeStruct((R, D), x.dtype)

    if (not training) or p == 0.0:
        cost = pl.CostEstimate(flops=R * D, transcendentals=0,
                               bytes_accessed=3 * R * D * itemsize)
        out2 = pl.pallas_call(
            _posenc_eval_kernel,
            out_shape=out_shape,
            grid=grid,
            in_specs=[row_spec, row_spec],
            out_specs=row_spec,
            compiler_params=compiler_params,
            cost_estimate=cost,
        )(x2, pe2)
        return out2.reshape(S, B, D)

    if p >= 1.0:
        return jnp.zeros((S, B, D), x.dtype)

    # TODO(synk): torch's dropout RNG stream cannot be matched bit-for-bit; the
    # inverted-dropout mask is drawn with jax.random here (the TPU hardware PRNG
    # would save one HBM read but has no interpret-mode lowering).
    if rng_key is None:
        rng_key = jax.random.PRNGKey(0)
    keep = jax.random.bernoulli(rng_key, 1.0 - p, (R, D))
    mask = keep.astype(x.dtype) * jnp.asarray(1.0 / (1.0 - p), x.dtype)

    cost = pl.CostEstimate(flops=2 * R * D, transcendentals=0,
                           bytes_accessed=4 * R * D * itemsize)
    out2 = pl.pallas_call(
        _posenc_train_kernel,
        out_shape=out_shape,
        grid=grid,
        in_specs=[row_spec, row_spec, row_spec],
        out_specs=row_spec,
        compiler_params=compiler_params,
        cost_estimate=cost,
    )(x2, pe2, mask)
    return out2.reshape(S, B, D)


# ----------------------------------------------------------------------------
# Demo / self-check
# ----------------------------------------------------------------------------
if __name__ == "__main__":
    S, B, D = 8, 2, 512          # seq=8, batch=2, d_model=512 (matches the spec)
    MAX_LEN = 50
    P_DROP = 0.1

    key = jax.random.PRNGKey(0)
    kx, kd = jax.random.split(key)
    x = jax.random.normal(kx, (S, B, D), dtype=jnp.float32)

    pe = make_positional_encoding(D, MAX_LEN)          # (50, 1, 512)

    # Eval-mode forward (dropout == identity, like nn.Dropout in .eval()).
    out = positional_encoding_forward(x, pe, p=P_DROP, training=False)
    out = jax.block_until_ready(out)

    ref = x + pe[:S]
    assert out.shape == (S, B, D)
    assert jnp.allclose(out, ref, atol=1e-6, rtol=1e-6)

    # Training-mode path: every surviving element must equal ref * 1/(1-p).
    out_tr = positional_encoding_forward(x, pe, p=P_DROP, training=True, rng_key=kd)
    out_tr = jax.block_until_ready(out_tr)
    assert out_tr.shape == (S, B, D)
    scale = 1.0 / (1.0 - P_DROP)
    nz = out_tr != 0.0
    assert jnp.allclose(jnp.where(nz, out_tr, 0.0),
                        jnp.where(nz, ref * scale, 0.0), atol=1e-5, rtol=1e-5)

    print("KERNEL_OK")
</pallas_src>

<mosaic_0001>
module attributes {stable_mosaic.version = 11 : i64} {
  func.func @_posenc_eval_kernel(%arg0: i32, %arg1: memref<16x512xf32, #tpu.memory_space<vmem>>, %arg2: memref<16x512xf32, #tpu.memory_space<vmem>>, %arg3: memref<16x512xf32, #tpu.memory_space<vmem>>) attributes {dimension_semantics = [#tpu.dimension_semantics<parallel>], iteration_bounds = array<i64: 1>, scalar_prefetch = 0 : i64, scratch_operands = 0 : i64, tpu.core_type = #tpu.core_type<tc>, window_params = [{transform_indices = @transform_0, window_bounds = array<i64: 16, 512>}, {transform_indices = @transform_1, window_bounds = array<i64: 16, 512>}, {transform_indices = @transform_2, window_bounds = array<i64: 16, 512>}]} {
    %c0 = arith.constant 0 : index
    %c0_0 = arith.constant 0 : index
    %0 = vector.load %arg1[%c0, %c0_0] : memref<16x512xf32, #tpu.memory_space<vmem>>, vector<16x512xf32>
    %c0_1 = arith.constant 0 : index
    %c0_2 = arith.constant 0 : index
    %1 = vector.load %arg2[%c0_1, %c0_2] : memref<16x512xf32, #tpu.memory_space<vmem>>, vector<16x512xf32>
    %2 = arith.addf %0, %1 : vector<16x512xf32>
    %c0_3 = arith.constant 0 : index
    %c0_4 = arith.constant 0 : index
    %3 = vector.load %arg3[%c0_3, %c0_4] : memref<16x512xf32, #tpu.memory_space<vmem>>, vector<16x512xf32>
    tpu.vector_store %arg3[%c0_3, %c0_4], %2 {strides = array<i32>} : memref<16x512xf32, #tpu.memory_space<vmem>>, vector<16x512xf32>,
    return
  }
  func.func @transform_0(%arg0: i32) -> (i32, i32) {
    %c0_i32 = arith.constant 0 : i32
    %c0_i32_0 = arith.constant 0 : i32
    return %arg0, %c0_i32 : i32, i32
  }
  func.func @transform_1(%arg0: i32) -> (i32, i32) {
    %c0_i32 = arith.constant 0 : i32
    %c0_i32_0 = arith.constant 0 : i32
    return %arg0, %c0_i32 : i32, i32
  }
  func.func @transform_2(%arg0: i32) -> (i32, i32) {
    %c0_i32 = arith.constant 0 : i32
    %c0_i32_0 = arith.constant 0 : i32
    return %arg0, %c0_i32 : i32, i32
  }
}

</mosaic_0001>

<bundles_post_ra>
// kernel: tpu_custom_call.1
= control target key start
LH: loop header
LB: loop body
LE: loop exit
PB: predicated region body
PF: predicated region fallthrough
CT: control target
= control target key end

     0   :  { %7 = vsyncpa [#allocation3], 0  ;;  %s232_s0 = inlined_call_operand.hbm [shape: f32[16,512], index: 0, kind: input, shape index: {}]   ;;  %s233_s1 = inlined_call_operand.hbm [shape: f32[16,512], index: 1, kind: input, shape index: {}]   ;;  %s234_s2 = inlined_call_operand.hbm [shape: f32[16,512], index: 2, kind: output, shape index: {}]  }
   0x1   :  { %8 = vsyncpa [#allocation6], 0 }
   0x2   :  { %9 = vsyncpa [#allocation4], 0  ;;  %s167_s9 = smov [#allocation2]   ;;  %s95_s13 = scalar_lea.hbm %s232_s0, 1024 }
   0x3   :  { %s15_s10 = sshll.u32 %s167_s9, 4  ;;  %p96_p0 = scmp.ne.s32.totalorder %s232_s0, %s95_s13  ;;  %s16_s10 = int_to_ptr.vmem [resolvable:$true] %s15_s10 }
   0x4   :  { %p99_p1 = scmp.lt.u32.totalorder %s95_s13, %s232_s0 }
   0x6   :  { %p101_p2 = pnand %p99_p1, %p96_p0 }
   0x8   :  { %104 = shalt.err (!%p101_p2)
}
   0x9   :  { %s105_s18 = scalar_lea.vmem %s16_s10, 1024  ;;  %p110_p4 = scmp.lt.s32.totalorder %s16_s10, %s16_s10 }
   0xa   :  { %p106_p3 = scmp.ne.s32.totalorder %s16_s10, %s105_s18  ;;  %p111_p5 = scmp.lt.s32.totalorder %s105_s18, %s105_s18 }
   0xc   :  { %p112_p6 = por %p111_p5, %p110_p4 }
   0xe   :  { %p113_p7 = pnand %p112_p6, %p106_p3 }
  0x10   :  { %116 = shalt.err (!%p113_p7)
}
  0x11   :  { %s168_s19 = smov 512   ;;  %s169_s20 = smov 32  }
  0x12   :  { %21 = dma.hbm_to_vmem [thread:$0]  %s232_s0, 1024, %s16_s10, [#allocation3], %s168_s19, %s168_s19, %s169_s20  }
  0x13   :  { %s170_s23 = smov [#allocation5]   ;;  %s117_s27 = scalar_lea.hbm %s233_s1, 1024 }
  0x14   :  { %s27_s24 = sshll.u32 %s170_s23, 4  ;;  %p118_p8 = scmp.ne.s32.totalorder %s233_s1, %s117_s27  ;;  %s28_s24 = int_to_ptr.vmem [resolvable:$true] %s27_s24 }
  0x15   :  { %p121_p9 = scmp.lt.u32.totalorder %s117_s27, %s233_s1 }
  0x17   :  { %p123_p10 = pnand %p121_p9, %p118_p8 }
  0x19   :  { %126 = shalt.err (!%p123_p10)
}
  0x1a   :  { %s127_s4 = scalar_lea.vmem %s28_s24, 1024  ;;  %p132_p12 = scmp.lt.s32.totalorder %s28_s24, %s28_s24 }
  0x1b   :  { %p128_p11 = scmp.ne.s32.totalorder %s28_s24, %s127_s4  ;;  %p133_p13 = scmp.lt.s32.totalorder %s127_s4, %s127_s4 }
  0x1d   :  { %p134_p0 = por %p133_p13, %p132_p12 }
  0x1f   :  { %p135_p1 = pnand %p134_p0, %p128_p11 }
  0x21   :  { %138 = shalt.err (!%p135_p1)
}
  0x22   :  { %33 = dma.hbm_to_vmem [thread:$0]  %s233_s1, 1024, %s28_s24, [#allocation6], %s168_s19, %s168_s19, %s169_s20  }
  0x23   :  { %161 = dma.done.wait [#allocation3], 1024  }
  0x24   :  { %162 = vsyncadd [#allocation3], 4294966272 }
  0x25   :  { %163 = dma.done.wait [#allocation6], 1024  }
  0x26   :  { %164 = vsyncadd [#allocation6], 4294966272  ;;  %v40_v0 = vld [vmem:[#allocation2] sm:$0xff]  ;;  %v41_v2 = vld [vmem:[#allocation2 + $0x8] sm:$0xff]  ;;  %s171_s1 = smov [#allocation7]  }
  0x27   :  { %v48_v1 = vld [vmem:[#allocation5] sm:$0xff]  ;;  %v49_v4 = vld [vmem:[#allocation5 + $0x8] sm:$0xff]  ;;  %v42_v5 = vld [vmem:[#allocation2 + $0x10] sm:$0xff]  ;;  %s77_s6 = sshll.u32 %s171_s1, 4  ;;  %s78_s6 = int_to_ptr.vmem [resolvable:$true] %s77_s6 }
  0x28   :  { %v56_v3 = vadd.f32 %v48_v1, %v40_v0  ;;  %v50_v6 = vld [vmem:[#allocation5 + $0x10] sm:$0xff]  ;;  %v57_v7 = vadd.f32 %v49_v4, %v41_v2  ;;  %v43_v9 = vld [vmem:[#allocation2 + $0x18] sm:$0xff]  ;;  %v44_v11 = vld [vmem:[#allocation2 + $0x20] sm:$0xff]  ;;  %s139_s7 = scalar_lea.vmem %s78_s6, 1024  ;;  %p144_p3 = scmp.lt.s32.totalorder %s78_s6, %s78_s6 }
  0x29   :  { %v58_v8 = vadd.f32 %v50_v6, %v42_v5  ;;  %v51_v10 = vld [vmem:[#allocation5 + $0x18] sm:$0xff]  ;;  %v52_v13 = vld [vmem:[#allocation5 + $0x20] sm:$0xff]  ;;  %v45_v14 = vld [vmem:[#allocation2 + $0x28] sm:$0xff]  ;;  %p140_p2 = scmp.ne.s32.totalorder %s78_s6, %s139_s7  ;;  %p145_p4 = scmp.lt.s32.totalorder %s139_s7, %s139_s7 }
  0x2a   :  { %64 = vst [vmem:[#allocation7] sm:$0xff] %v56_v3  ;;  %v59_v12 = vadd.f32 %v51_v10, %v43_v9  ;;  %v53_v15 = vld [vmem:[#allocation5 + $0x28] sm:$0xff]  ;;  %65 = vst [vmem:[#allocation7 + $0x8] sm:$0xff] %v57_v7  ;;  %v60_v16 = vadd.f32 %v52_v13, %v44_v11  ;;  %v46_v18 = vld [vmem:[#allocation2 + $0x30] sm:$0xff] }
  0x2b   :  { %66 = vst [vmem:[#allocation7 + $0x10] sm:$0xff] %v58_v8  ;;  %v61_v17 = vadd.f32 %v53_v15, %v45_v14  ;;  %v54_v19 = vld [vmem:[#allocation5 + $0x30] sm:$0xff]  ;;  %v47_v20 = vld [vmem:[#allocation2 + $0x38] sm:$0xff]  ;;  %p146_p5 = por %p145_p4, %p144_p3 }
  0x2c   :  { %67 = vst [vmem:[#allocation7 + $0x18] sm:$0xff] %v59_v12  ;;  %v62_v21 = vadd.f32 %v54_v19, %v46_v18  ;;  %v55_v22 = vld [vmem:[#allocation5 + $0x38] sm:$0xff]  ;;  %68 = vst [vmem:[#allocation7 + $0x20] sm:$0xff] %v60_v16 }
  0x2d   :  { %69 = vst [vmem:[#allocation7 + $0x28] sm:$0xff] %v61_v17  ;;  %v63_v23 = vadd.f32 %v55_v22, %v47_v20  ;;  %p147_p6 = pnand %p146_p5, %p140_p2 }
  0x2e   :  { %70 = vst [vmem:[#allocation7 + $0x30] sm:$0xff] %v62_v21 }
  0x2f   :  { %71 = vst [vmem:[#allocation7 + $0x38] sm:$0xff] %v63_v23 }
  0x30   :  { %150 = shalt.err (!%p147_p6)
}
  0x31   :  { %s151_s10 = scalar_lea.hbm %s234_s2, 1024 }
  0x32   :  { %p152_p7 = scmp.ne.s32.totalorder %s234_s2, %s151_s10  ;;  %p155_p8 = scmp.lt.u32.totalorder %s151_s10, %s234_s2 }
  0x34   :  { %p157_p9 = pnand %p155_p8, %p152_p7 }
  0x36   :  { %160 = shalt.err (!%p157_p9)
}
  0x37   :  { %83 = dma.vmem_to_hbm [thread:$0]  %s78_s6, 1024, %s234_s2, [#allocation4], %s168_s19, %s168_s19, %s169_s20  }
  0x38   :  { %165 = dma.done.wait [#allocation4], 1024  }
  0x39   :  { %166 = vsyncadd [#allocation4], 4294966272 }
  0x3a   :  { %87 = vsyncpa [#allocation3], 1 }
  0x3b   :  { %88 = vsyncpa [#allocation6], 1 }
  0x3c   :  { %89 = vsyncpa [#allocation4], 1 }

</bundles_post_ra>
